<compile_context>
chip_gen: v5e
topology: v5e:2x2
jax: 0.10.0
libtpu: 0.0.40
codegen_flags: <defaults>
</compile_context>

<pallas_src>
import functools

import jax
import jax.numpy as jnp
from jax.experimental import pallas as pl
from jax.experimental.pallas import tpu as pltpu


# ---------------------------------------------------------------------------
# Kernels: pure HBM->HBM DMA writes into the aliased cache buffer.
# ---------------------------------------------------------------------------
def _prefill_dma_kernel(s_in, cache_in_ref, cur_ref, out_ref, sem):
    """prev[:, :, :s_in, :] = cur  via one strided HBM->HBM DMA."""
    del cache_in_ref  # only carries the in-place alias; never read or DMA'd
    cp = pltpu.make_async_copy(cur_ref, out_ref.at[:, :, 0:s_in, :], sem)
    cp.start()
    cp.wait()


def _decode_dma_kernel(pos_ref, cache_in_ref, cur_ref, out_ref, sem):
    """prev[:, :, pos:pos+1, :] = cur  (single-token decode write, 1 row)."""
    del cache_in_ref
    pos = pos_ref[0]
    cp = pltpu.make_async_copy(cur_ref, out_ref.at[:, :, pl.ds(pos, 1), :], sem)
    cp.start()
    cp.wait()


def _decode_fused_dma_kernel(pos_ref, k_in_ref, v_in_ref, k_cur_ref, v_cur_ref,
                             k_out_ref, v_out_ref, sem):
    """Fused K+V decode write: one kernel dispatch, two overlapped DMAs."""
    del k_in_ref, v_in_ref
    pos = pos_ref[0]
    ck = pltpu.make_async_copy(k_cur_ref, k_out_ref.at[:, :, pl.ds(pos, 1), :],
                               sem.at[0])
    cv = pltpu.make_async_copy(v_cur_ref, v_out_ref.at[:, :, pl.ds(pos, 1), :],
                               sem.at[1])
    ck.start()
    cv.start()
    ck.wait()
    cv.wait()


# ---------------------------------------------------------------------------
# pallas_call wrappers
# ---------------------------------------------------------------------------
def _prefill_update(cache, cur):
    """prev[:, :, :S_in, :].copy_(cur) without touching the rest of the cache."""
    s_in = cur.shape[2]
    cur = cur.astype(cache.dtype)
    return pl.pallas_call(
        functools.partial(_prefill_dma_kernel, s_in),
        out_shape=jax.ShapeDtypeStruct(cache.shape, cache.dtype),
        in_specs=[
            pl.BlockSpec(memory_space=pl.ANY),   # aliased cache (never read)
            pl.BlockSpec(memory_space=pl.ANY),   # cur (DMA source, stays in HBM)
        ],
        out_specs=pl.BlockSpec(memory_space=pl.ANY),
        scratch_shapes=[pltpu.SemaphoreType.DMA(())],
        input_output_aliases={0: 0},             # cache buffer -> output (in-place)
    )(cache, cur)


def _decode_pos(idx, seq_len):
    """idx - 1 as a clamped (1,) int32 array (DMA has no implicit bounds check)."""
    idx_arr = jnp.asarray(idx, dtype=jnp.int32).reshape(-1)
    return jnp.clip(idx_arr[:1] - 1, 0, seq_len - 1)


def _decode_update(cache, cur, idx):
    """prev.index_copy_(2, idx - 1, cur) for a single-token decode step."""
    _, _, S, _ = cache.shape
    cur = cur.astype(cache.dtype)
    pos = _decode_pos(idx, S)
    return pl.pallas_call(
        _decode_dma_kernel,
        out_shape=jax.ShapeDtypeStruct(cache.shape, cache.dtype),
        in_specs=[
            pl.BlockSpec(memory_space=pltpu.MemorySpace.SMEM),  # pos scalar
            pl.BlockSpec(memory_space=pl.ANY),                  # aliased cache
            pl.BlockSpec(memory_space=pl.ANY),                  # cur row
        ],
        out_specs=pl.BlockSpec(memory_space=pl.ANY),
        scratch_shapes=[pltpu.SemaphoreType.DMA(())],
        input_output_aliases={1: 0},              # cache (input idx 1) -> output 0
    )(pos, cache, cur)


def decode_update_fused(k_cache, v_cache, k_cur, v_cur, idx):
    """Optional helper: update K and V caches for one decode token in a single
    kernel dispatch (decode is latency-bound, so kernel count dominates)."""
    S = k_cache.shape[2]
    pos = _decode_pos(idx, S)
    k_cur = k_cur.astype(k_cache.dtype)
    v_cur = v_cur.astype(v_cache.dtype)
    return pl.pallas_call(
        _decode_fused_dma_kernel,
        out_shape=(jax.ShapeDtypeStruct(k_cache.shape, k_cache.dtype),
                   jax.ShapeDtypeStruct(v_cache.shape, v_cache.dtype)),
        in_specs=[pl.BlockSpec(memory_space=pltpu.MemorySpace.SMEM)]
                 + [pl.BlockSpec(memory_space=pl.ANY)] * 4,
        out_specs=(pl.BlockSpec(memory_space=pl.ANY),
                   pl.BlockSpec(memory_space=pl.ANY)),
        scratch_shapes=[pltpu.SemaphoreType.DMA((2,))],
        input_output_aliases={1: 0, 2: 1},        # k_cache->out0, v_cache->out1
    )(pos, k_cache, v_cache, k_cur, v_cur)


# ---------------------------------------------------------------------------
# KVCache "module" mirroring the PyTorch class (functional cache updates)
# ---------------------------------------------------------------------------
class KVCache:
    def __init__(self):
        self.cache = None
        self.inp_seq_len = -1

    def allocate(self, inp_seq_len, dtype, shape, device=None):
        del device  # no device arg in JAX; default device placement
        if self.cache is None or self.cache.shape != shape:
            self.inp_seq_len = inp_seq_len
            self.cache = jnp.zeros(shape, dtype=dtype)
        else:
            assert self.inp_seq_len == inp_seq_len, (
                f"inp_seq_len must be the same. self.inp_seq_len:{self.inp_seq_len} "
                f"inp_seq_len:{inp_seq_len}")
            self.cache = jnp.zeros_like(self.cache)

    def update(self, prev, cur, dim, idx, inp_seq_len):
        orig_cur = cur
        if prev.shape == cur.shape:
            # prev.copy_(cur): arrays are immutable in JAX, so adopting `cur`
            # as the cache is an exact (and free) equivalent of a full copy.
            self.cache = cur if cur.dtype == prev.dtype else cur.astype(prev.dtype)
            return orig_cur
        if cur.shape[2] > 1 and cur.shape[2] <= prev.shape[2]:
            assert dim == 2, "KV-cache prefill only supports seq dim = 2"
            self.cache = _prefill_update(prev, cur)
            return orig_cur
        assert cur.shape[2] == 1, (
            f"Cannot update kv-cache. Unsupported shapes. prev:{prev.shape} cur:{cur.shape}")
        if idx is not None:
            assert dim == 2, "KV-cache decode index_copy only supports seq dim = 2"
            self.cache = _decode_update(prev, cur, idx)
            return self.cache
        # TODO(synk): torch.cat growth path (idx is None) has no in-place Pallas
        # equivalent (output shape grows); kept as plain-JAX concatenate.
        return jnp.concatenate((prev, cur), axis=dim)

    def get_shape(self):
        if self.cache is None:
            return None
        return self.cache.shape

    def forward(self, cur, dim, idx):
        return self.update(self.cache, cur, dim, idx, self.inp_seq_len)

    __call__ = forward


# ---------------------------------------------------------------------------
# Demo / self-test
# ---------------------------------------------------------------------------
if __name__ == "__main__":
    key = jax.random.PRNGKey(0)
    B, H, S_MAX, D = 2, 4, 16, 128
    INP_SEQ = 8
    dtype = jnp.bfloat16   # native KV dtype; kernels are dtype-agnostic.

    kv = KVCache()
    kv.allocate(INP_SEQ, dtype, (B, H, S_MAX, D))

    k1, k2, k3, k4, k5, k6, k7, k8 = jax.random.split(key, 8)

    # ---- prefill step: cur seq_len == INP_SEQ > 1 ---------------------------
    cur_prefill = jax.random.normal(k1, (B, H, INP_SEQ, D), dtype=dtype)
    out_prefill = kv(cur_prefill, dim=2, idx=None)
    jax.block_until_ready(kv.cache)

    ref_cache = jnp.zeros((B, H, S_MAX, D), dtype=dtype).at[:, :, :INP_SEQ, :].set(cur_prefill)
    assert jnp.array_equal(kv.cache, ref_cache), "prefill cache mismatch"
    assert jnp.array_equal(out_prefill, cur_prefill), "prefill return mismatch"

    # ---- decode step: cur seq_len == 1, index_copy at idx - 1 ---------------
    cur_decode = jax.random.normal(k2, (B, H, 1, D), dtype=dtype)
    idx = jnp.array([INP_SEQ + 1], dtype=jnp.int32)   # writes position INP_SEQ
    out_decode = kv(cur_decode, dim=2, idx=idx)
    jax.block_until_ready(out_decode)

    ref_cache = ref_cache.at[:, :, INP_SEQ:INP_SEQ + 1, :].set(cur_decode)
    assert jnp.array_equal(out_decode, ref_cache), "decode return mismatch"
    assert jnp.array_equal(kv.cache, ref_cache), "decode cache mismatch"

    # ---- same-shape path: prev.copy_(cur) ------------------------------------
    full = jax.random.normal(k3, (B, H, S_MAX, D), dtype=dtype)
    out_full = kv(full, dim=2, idx=None)
    jax.block_until_ready(out_full)
    assert jnp.array_equal(kv.cache, full), "same-shape copy mismatch"
    assert jnp.array_equal(out_full, full), "same-shape return mismatch"

    # ---- unaligned prefill (S_in = 5, not 8/16-aligned): same DMA path -------
    kv2 = KVCache()
    kv2.allocate(5, dtype, (B, H, S_MAX, D))
    cur_un = jax.random.normal(k4, (B, H, 5, D), dtype=dtype)
    _ = kv2(cur_un, dim=2, idx=None)
    jax.block_until_ready(kv2.cache)
    ref2 = jnp.zeros((B, H, S_MAX, D), dtype=dtype).at[:, :, :5, :].set(cur_un)
    assert jnp.array_equal(kv2.cache, ref2), "unaligned prefill mismatch"

    # ---- fused K+V decode update (single kernel dispatch) --------------------
    k_cache0 = jax.random.normal(k5, (B, H, S_MAX, D), dtype=dtype)
    v_cache0 = jax.random.normal(k6, (B, H, S_MAX, D), dtype=dtype)
    k_new = jax.random.normal(k7, (B, H, 1, D), dtype=dtype)
    v_new = jax.random.normal(k8, (B, H, 1, D), dtype=dtype)
    idx2 = jnp.array([4], dtype=jnp.int32)            # writes position 3
    # Compute references BEFORE the call: the caches are donated (aliased).
    k_ref = k_cache0.at[:, :, 3:4, :].set(k_new)
    v_ref = v_cache0.at[:, :, 3:4, :].set(v_new)
    k_out, v_out = decode_update_fused(k_cache0, v_cache0, k_new, v_new, idx2)
    jax.block_until_ready((k_out, v_out))
    assert jnp.array_equal(k_out, k_ref), "fused decode K mismatch"
    assert jnp.array_equal(v_out, v_ref), "fused decode V mismatch"

    print("KERNEL_OK")
</pallas_src>

<mosaic_0001>
module attributes {stable_mosaic.version = 11 : i64} {
  func.func @_prefill_dma_kernel(%arg0: memref<2x4x16x128xbf16, #tpu.memory_space<any>>, %arg1: memref<2x4x8x128xbf16, #tpu.memory_space<any>>, %arg2: memref<2x4x16x128xbf16, #tpu.memory_space<any>>, %arg3: memref<!tpu.dma_semaphore, #tpu.memory_space<semaphore_mem>>) attributes {dimension_semantics = [], scalar_prefetch = 0 : i64, scratch_operands = 1 : i64, tpu.core_type = #tpu.core_type<tc>} {
    %c0_i32 = arith.constant 0 : i32
    %c0_i32_0 = arith.constant 0 : i32
    %c0_i32_1 = arith.constant 0 : i32
    %c0_i32_2 = arith.constant 0 : i32
    %0 = tpu.memref_slice %arg2[%c0_i32, %c0_i32_0, %c0_i32_1, %c0_i32_2] : memref<2x4x16x128xbf16, #tpu.memory_space<any>> -> memref<2x4x8x128xbf16, #tpu.memory_space<any>>
    tpu.enqueue_dma source(%arg1 : memref<2x4x8x128xbf16, #tpu.memory_space<any>>) target(%0 : memref<2x4x8x128xbf16, #tpu.memory_space<any>>) target_semaphore(%arg3 : memref<!tpu.dma_semaphore, #tpu.memory_space<semaphore_mem>>)
    %c0_i32_3 = arith.constant 0 : i32
    %c0_i32_4 = arith.constant 0 : i32
    %c0_i32_5 = arith.constant 0 : i32
    %c0_i32_6 = arith.constant 0 : i32
    %1 = tpu.memref_slice %arg2[%c0_i32_3, %c0_i32_4, %c0_i32_5, %c0_i32_6] : memref<2x4x16x128xbf16, #tpu.memory_space<any>> -> memref<2x4x8x128xbf16, #tpu.memory_space<any>>
    tpu.wait_dma2 semaphore(%arg3 : memref<!tpu.dma_semaphore, #tpu.memory_space<semaphore_mem>>) src(%arg1 : memref<2x4x8x128xbf16, #tpu.memory_space<any>>) dst(%1 : memref<2x4x8x128xbf16, #tpu.memory_space<any>>)
    return
  }
}

</mosaic_0001>

<bundles_post_ra>
// kernel: tpu_custom_call.1
= control target key start
LH: loop header
LB: loop body
LE: loop exit
PB: predicated region body
PF: predicated region fallthrough
CT: control target
= control target key end

     0   :  { %s57_s15 = smov 64   ;;  %s58_s16 = smov 128   ;;  %s81_s0 = inlined_call_operand.hbm [shape: bf16[2,4,16,128], index: 0, kind: input, shape index: {}, may-alias: {0,2}]   ;;  %s82_s1 = inlined_call_operand.vmem [shape: bf16[2,4,8,128], index: 1, kind: input, shape index: {}]   ;;  %s83_s2 = inlined_call_operand.hbm [shape: bf16[2,4,16,128], index: 2, kind: output, shape index: {}, may-alias: {0,2}]  }
   0x1   :  { %s7_s11 = sshll.u32 %s82_s1, 4  ;;  %s9_s14 = sshll.u32 %s83_s2, 4  ;;  %s8_s11 = int_to_ptr.vmem [resolvable:$true] %s7_s11  ;;  %s10_s14 = int_to_ptr.hbm [resolvable:$true] %s9_s14 }
   0x2   :  { %s59_s17 = smov 4  }
   0x3   :  { %14 = dma.vmem_to_hbm [thread:$0]  %s8_s11, 512, %s10_s14, [#allocation2], %s57_s15, %s58_s16, %s59_s17 }
   0x4   :  { %55 = dma.done.wait [#allocation2], 512 }
   0x5   :  { %56 = vsyncadd [#allocation2], 4294966784 }
   0x6   :  { %21 = vsyncmov [#allocation2] }
   0x9   :  { %s22_s0 = vpop.sfrf %21 }
   0xa   :  { %p27_p0 = scmp.ne.s32.totalorder %s22_s0, 0 }
   0xc   :  { %26 = shalt.err (%p27_p0)  }

</bundles_post_ra>
